<compile_context>
chip_gen: v7x
topology: tpu7x:2x2x1
jax: 0.10.0
libtpu: 0.0.40
codegen_flags: <defaults>
</compile_context>

<pallas_src>
import jax
import jax.numpy as jnp
from jax.experimental import pallas as pl
from jax.experimental.pallas import tpu as pltpu


def _round_up(x, m):
    return (x + m - 1) // m * m


def _batch_tile(B):
    """Batch tile: small B -> one exact tile; large B -> >=2 big (<=1024) tiles."""
    if B < 64:
        return _round_up(B, 8)            # single step; tiny batches are launch-bound
    # At least 2 grid steps so both v7x TensorCores get work; cap at 1024 rows.
    return min(1024, _round_up(pl.cdiv(B, 2), 16))


# ---------------------------------------------------------------------------
# Kernel: one batch tile, all six Linear layers fused (4 matmul "passes").
# ---------------------------------------------------------------------------
def _make_kernel(hidden):
    H = hidden

    def kernel(zeo_ref, osda_ref, w1z_ref, w1o_ref, w2_ref, w3_ref, w4_ref,
               b_ref, out_ref):
        f32 = jnp.float32
        cdt = w2_ref.dtype                        # bf16 MXU operand dtype

        zeo = zeo_ref[...].astype(cdt)            # (TB, zd)
        osda = osda_ref[...].astype(cdt)          # (TB, od)

        # Branch layer 1 (+ReLU), both branches fused without any concat:
        #   cols [0:H]  = zeo @ zw1 + zb1,   cols [H:2H] = osda @ ow1 + ob1
        h = (jnp.dot(zeo, w1z_ref[...], preferred_element_type=f32)
             + jnp.dot(osda, w1o_ref[...], preferred_element_type=f32)
             + b_ref[0:1, :])
        h = jnp.maximum(h, 0.0)

        # Branch layer 2 (block-diagonal(zw2, ow2)); output is already
        # concat([h_zeo, h_osda]) along the lane axis.
        h = jnp.dot(h.astype(cdt), w2_ref[...], preferred_element_type=f32) + b_ref[1:2, :]

        # Merge layer 1 (+ReLU): natural (2H, H) weight.
        h = jnp.dot(h.astype(cdt), w3_ref[...], preferred_element_type=f32) + b_ref[2:3, :H]
        h = jnp.maximum(h, 0.0)

        # Merge layer 2: (H, H).
        out = jnp.dot(h.astype(cdt), w4_ref[...], preferred_element_type=f32) + b_ref[3:4, :H]

        out_ref[...] = out.astype(out_ref.dtype)

    return kernel


# ---------------------------------------------------------------------------
# Host-side one-time packing of the per-layer parameters.
# NOTE: expects weights in [in, out] layout (real PyTorch nn.Linear weights are
# [out, in] and must be transposed once before calling pack_params).
# ---------------------------------------------------------------------------
def pack_params(params, zeo_dim, osda_dim, hidden_dim, compute_dtype=jnp.bfloat16):
    H = hidden_dim
    F = 2 * H

    w1z = jnp.zeros((zeo_dim, F), jnp.float32).at[:, :H].set(params["zw1"])
    w1o = jnp.zeros((osda_dim, F), jnp.float32).at[:, H:].set(params["ow1"])

    w2 = jnp.zeros((F, F), jnp.float32)
    w2 = w2.at[:H, :H].set(params["zw2"]).at[H:, H:].set(params["ow2"])

    w3 = jnp.asarray(params["mw1"])               # (2H, H), used as-is
    w4 = jnp.asarray(params["mw2"])               # (H, H), used as-is

    b = jnp.zeros((4, F), jnp.float32)
    b = b.at[0, :H].set(params["zb1"]).at[0, H:].set(params["ob1"])
    b = b.at[1, :H].set(params["zb2"]).at[1, H:].set(params["ob2"])
    b = b.at[2, :H].set(params["mb1"])
    b = b.at[3, :H].set(params["mb2"])

    return {
        "w1z": w1z.astype(compute_dtype),
        "w1o": w1o.astype(compute_dtype),
        "w2": w2.astype(compute_dtype),
        "w3": w3.astype(compute_dtype),
        "w4": w4.astype(compute_dtype),
        "b": b,                                   # f32 bias/ReLU tail
        "zeo_dim": zeo_dim,
        "osda_dim": osda_dim,
        "hidden": H,
    }


# ---------------------------------------------------------------------------
# Wrapper: raw inputs in, (B, hidden) bf16 out.  No host-side pack or slice.
# ---------------------------------------------------------------------------
def fusion_encoder(zeolite, osda, packed, *, out_dtype=jnp.bfloat16):
    H = packed["hidden"]
    F = 2 * H
    zd, od = packed["zeo_dim"], packed["osda_dim"]
    B = zeolite.shape[0]

    TB = _batch_tile(B)
    grid = (pl.cdiv(B, TB),)

    # Useful (unpadded) work, as a scheduling hint for XLA.
    flops = 2 * B * (zd * H + od * H + 5 * H * H)
    bytes_accessed = (B * (zd + od) * zeolite.dtype.itemsize
                      + (zd * F + od * F + F * F + F * H + H * H) * 2   # bf16 weights
                      + 4 * F * 4                                       # f32 biases
                      + B * H * jnp.dtype(out_dtype).itemsize)          # bf16 output

    out = pl.pallas_call(
        _make_kernel(H),
        out_shape=jax.ShapeDtypeStruct((B, H), out_dtype),
        grid=grid,
        in_specs=[
            pl.BlockSpec((TB, zd), lambda i: (i, 0)),      # zeolite: batch-tiled
            pl.BlockSpec((TB, od), lambda i: (i, 0)),      # osda:    batch-tiled
            pl.BlockSpec((zd, F), lambda i: (0, 0)),       # weights: VMEM-resident
            pl.BlockSpec((od, F), lambda i: (0, 0)),
            pl.BlockSpec((F, F), lambda i: (0, 0)),
            pl.BlockSpec((F, H), lambda i: (0, 0)),
            pl.BlockSpec((H, H), lambda i: (0, 0)),
            pl.BlockSpec((4, F), lambda i: (0, 0)),        # biases:  VMEM-resident
        ],
        out_specs=pl.BlockSpec((TB, H), lambda i: (i, 0)),
        compiler_params=pltpu.CompilerParams(
            dimension_semantics=("parallel",)),
        cost_estimate=pl.CostEstimate(
            flops=flops, transcendentals=0, bytes_accessed=bytes_accessed),
    )(zeolite, osda, packed["w1z"], packed["w1o"], packed["w2"],
      packed["w3"], packed["w4"], packed["b"])

    # Output is bf16 (halves writeback); consumers that need f32 can upcast.
    return out


# ---------------------------------------------------------------------------
# Deterministic synthetic init (PyTorch-style uniform(-1/sqrt(fan_in), +)).
# Weights stored pre-transposed as [in, out]; biases 1-D [out].
# ---------------------------------------------------------------------------
def init_params(key, zeo_dim, osda_dim, hidden_dim, dtype=jnp.float32):
    def linear(k, fan_in, fan_out):
        kw, kb = jax.random.split(k)
        bound = 1.0 / jnp.sqrt(fan_in)
        w = jax.random.uniform(kw, (fan_in, fan_out), dtype, -bound, bound)
        b = jax.random.uniform(kb, (fan_out,), dtype, -bound, bound)
        return w, b

    ks = jax.random.split(key, 6)
    zw1, zb1 = linear(ks[0], zeo_dim, hidden_dim)
    zw2, zb2 = linear(ks[1], hidden_dim, hidden_dim)
    ow1, ob1 = linear(ks[2], osda_dim, hidden_dim)
    ow2, ob2 = linear(ks[3], hidden_dim, hidden_dim)
    mw1, mb1 = linear(ks[4], 2 * hidden_dim, hidden_dim)
    mw2, mb2 = linear(ks[5], hidden_dim, hidden_dim)
    return {"zw1": zw1, "zb1": zb1, "zw2": zw2, "zb2": zb2,
            "ow1": ow1, "ob1": ob1, "ow2": ow2, "ob2": ob2,
            "mw1": mw1, "mb1": mb1, "mw2": mw2, "mb2": mb2}


def fusion_encoder_ref(zeolite, osda, p):
    """Pure-JAX f32 reference (matches the PyTorch module)."""
    hz = jnp.maximum(zeolite @ p["zw1"] + p["zb1"], 0.0) @ p["zw2"] + p["zb2"]
    ho = jnp.maximum(osda @ p["ow1"] + p["ob1"], 0.0) @ p["ow2"] + p["ob2"]
    cat = jnp.concatenate([hz, ho], axis=-1)
    hm = jnp.maximum(cat @ p["mw1"] + p["mb1"], 0.0)
    return hm @ p["mw2"] + p["mb2"]


if __name__ == "__main__":
    B, ZEO_DIM, OSDA_DIM, HIDDEN = 8, 16, 24, 32

    key = jax.random.PRNGKey(0)
    k_zeo, k_osda, k_params = jax.random.split(key, 3)

    zeolite = jax.random.normal(k_zeo, (B, ZEO_DIM), jnp.float32)
    osda = jax.random.normal(k_osda, (B, OSDA_DIM), jnp.float32)
    params = init_params(k_params, ZEO_DIM, OSDA_DIM, HIDDEN)
    packed = pack_params(params, ZEO_DIM, OSDA_DIM, HIDDEN)

    out = fusion_encoder(zeolite, osda, packed)
    out = jax.block_until_ready(out)

    ref = fusion_encoder_ref(zeolite, osda, params)
    assert out.shape == (B, HIDDEN)
    # bf16 MXU operands + bf16 output -> loosened tolerance vs pure-f32 reference.
    assert jnp.allclose(out.astype(jnp.float32), ref, atol=5e-2, rtol=5e-2), \
        "mismatch vs reference"

    print("KERNEL_OK")
</pallas_src>

<mosaic_0001>
module attributes {stable_mosaic.version = 11 : i64} {
  func.func @kernel(%arg0: i32, %arg1: memref<8x16xf32, #tpu.memory_space<vmem>>, %arg2: memref<8x24xf32, #tpu.memory_space<vmem>>, %arg3: memref<16x64xbf16, #tpu.memory_space<vmem>>, %arg4: memref<24x64xbf16, #tpu.memory_space<vmem>>, %arg5: memref<64x64xbf16, #tpu.memory_space<vmem>>, %arg6: memref<64x32xbf16, #tpu.memory_space<vmem>>, %arg7: memref<32x32xbf16, #tpu.memory_space<vmem>>, %arg8: memref<4x64xf32, #tpu.memory_space<vmem>>, %arg9: memref<8x32xbf16, #tpu.memory_space<vmem>>) attributes {dimension_semantics = [#tpu.dimension_semantics<parallel>], iteration_bounds = array<i64: 1>, scalar_prefetch = 0 : i64, scratch_operands = 0 : i64, tpu.core_type = #tpu.core_type<tc>, window_params = [{transform_indices = @transform_0, window_bounds = array<i64: 8, 16>}, {transform_indices = @transform_1, window_bounds = array<i64: 8, 24>}, {pipeline_mode = #tpu.pipeline_mode<synchronous>, transform_indices = @transform_2, window_bounds = array<i64: 16, 64>}, {pipeline_mode = #tpu.pipeline_mode<synchronous>, transform_indices = @transform_3, window_bounds = array<i64: 24, 64>}, {pipeline_mode = #tpu.pipeline_mode<synchronous>, transform_indices = @transform_4, window_bounds = array<i64: 64, 64>}, {pipeline_mode = #tpu.pipeline_mode<synchronous>, transform_indices = @transform_5, window_bounds = array<i64: 64, 32>}, {pipeline_mode = #tpu.pipeline_mode<synchronous>, transform_indices = @transform_6, window_bounds = array<i64: 32, 32>}, {pipeline_mode = #tpu.pipeline_mode<synchronous>, transform_indices = @transform_7, window_bounds = array<i64: 4, 64>}, {transform_indices = @transform_8, window_bounds = array<i64: 8, 32>}]} {
    %c0 = arith.constant 0 : index
    %c0_0 = arith.constant 0 : index
    %0 = vector.load %arg1[%c0, %c0_0] : memref<8x16xf32, #tpu.memory_space<vmem>>, vector<8x16xf32>
    %1 = arith.truncf %0 : vector<8x16xf32> to vector<8x16xbf16>
    %c0_1 = arith.constant 0 : index
    %c0_2 = arith.constant 0 : index
    %2 = vector.load %arg2[%c0_1, %c0_2] : memref<8x24xf32, #tpu.memory_space<vmem>>, vector<8x24xf32>
    %3 = arith.truncf %2 : vector<8x24xf32> to vector<8x24xbf16>
    %c0_3 = arith.constant 0 : index
    %c0_4 = arith.constant 0 : index
    %4 = vector.load %arg3[%c0_3, %c0_4] : memref<16x64xbf16, #tpu.memory_space<vmem>>, vector<16x64xbf16>
    %cst = arith.constant dense<0.000000e+00> : vector<8x64xf32>
    %5 = tpu.matmul %1, %4, %cst {dimension_numbers = #tpu.dot_dimension_numbers<[1], [0], [0], [1], [0, 0, 1, 1], [], []>} : vector<8x16xbf16>, vector<16x64xbf16>, vector<8x64xf32> -> vector<8x64xf32>
    %c0_5 = arith.constant 0 : index
    %c0_6 = arith.constant 0 : index
    %6 = vector.load %arg4[%c0_5, %c0_6] : memref<24x64xbf16, #tpu.memory_space<vmem>>, vector<24x64xbf16>
    %cst_7 = arith.constant dense<0.000000e+00> : vector<8x64xf32>
    %7 = tpu.matmul %3, %6, %cst_7 {dimension_numbers = #tpu.dot_dimension_numbers<[1], [0], [0], [1], [0, 0, 1, 1], [], []>} : vector<8x24xbf16>, vector<24x64xbf16>, vector<8x64xf32> -> vector<8x64xf32>
    %8 = arith.addf %5, %7 : vector<8x64xf32>
    %c0_8 = arith.constant 0 : index
    %c0_9 = arith.constant 0 : index
    %9 = vector.load %arg8[%c0_8, %c0_9] : memref<4x64xf32, #tpu.memory_space<vmem>>, vector<1x64xf32>
    %10 = vector.broadcast %9 : vector<1x64xf32> to vector<8x64xf32>
    %11 = arith.addf %8, %10 : vector<8x64xf32>
    %cst_10 = arith.constant 0.000000e+00 : f32
    %12 = vector.broadcast %cst_10 : f32 to vector<8x64xf32>
    %13 = arith.maximumf %11, %12 : vector<8x64xf32>
    %14 = arith.truncf %13 : vector<8x64xf32> to vector<8x64xbf16>
    %c0_11 = arith.constant 0 : index
    %c0_12 = arith.constant 0 : index
    %15 = vector.load %arg5[%c0_11, %c0_12] : memref<64x64xbf16, #tpu.memory_space<vmem>>, vector<64x64xbf16>
    %cst_13 = arith.constant dense<0.000000e+00> : vector<8x64xf32>
    %16 = tpu.matmul %14, %15, %cst_13 {dimension_numbers = #tpu.dot_dimension_numbers<[1], [0], [0], [1], [0, 0, 1, 1], [], []>} : vector<8x64xbf16>, vector<64x64xbf16>, vector<8x64xf32> -> vector<8x64xf32>
    %c1 = arith.constant 1 : index
    %c0_14 = arith.constant 0 : index
    %17 = vector.load %arg8[%c1, %c0_14] : memref<4x64xf32, #tpu.memory_space<vmem>>, vector<1x64xf32>
    %18 = vector.broadcast %17 : vector<1x64xf32> to vector<8x64xf32>
    %19 = arith.addf %16, %18 : vector<8x64xf32>
    %20 = arith.truncf %19 : vector<8x64xf32> to vector<8x64xbf16>
    %c0_15 = arith.constant 0 : index
    %c0_16 = arith.constant 0 : index
    %21 = vector.load %arg6[%c0_15, %c0_16] : memref<64x32xbf16, #tpu.memory_space<vmem>>, vector<64x32xbf16>
    %cst_17 = arith.constant dense<0.000000e+00> : vector<8x32xf32>
    %22 = tpu.matmul %20, %21, %cst_17 {dimension_numbers = #tpu.dot_dimension_numbers<[1], [0], [0], [1], [0, 0, 1, 1], [], []>} : vector<8x64xbf16>, vector<64x32xbf16>, vector<8x32xf32> -> vector<8x32xf32>
    %c2 = arith.constant 2 : index
    %c0_18 = arith.constant 0 : index
    %23 = vector.load %arg8[%c2, %c0_18] : memref<4x64xf32, #tpu.memory_space<vmem>>, vector<1x32xf32>
    %24 = vector.broadcast %23 : vector<1x32xf32> to vector<8x32xf32>
    %25 = arith.addf %22, %24 : vector<8x32xf32>
    %cst_19 = arith.constant 0.000000e+00 : f32
    %26 = vector.broadcast %cst_19 : f32 to vector<8x32xf32>
    %27 = arith.maximumf %25, %26 : vector<8x32xf32>
    %28 = arith.truncf %27 : vector<8x32xf32> to vector<8x32xbf16>
    %c0_20 = arith.constant 0 : index
    %c0_21 = arith.constant 0 : index
    %29 = vector.load %arg7[%c0_20, %c0_21] : memref<32x32xbf16, #tpu.memory_space<vmem>>, vector<32x32xbf16>
    %cst_22 = arith.constant dense<0.000000e+00> : vector<8x32xf32>
    %30 = tpu.matmul %28, %29, %cst_22 {dimension_numbers = #tpu.dot_dimension_numbers<[1], [0], [0], [1], [0, 0, 1, 1], [], []>} : vector<8x32xbf16>, vector<32x32xbf16>, vector<8x32xf32> -> vector<8x32xf32>
    %c3 = arith.constant 3 : index
    %c0_23 = arith.constant 0 : index
    %31 = vector.load %arg8[%c3, %c0_23] : memref<4x64xf32, #tpu.memory_space<vmem>>, vector<1x32xf32>
    %32 = vector.broadcast %31 : vector<1x32xf32> to vector<8x32xf32>
    %33 = arith.addf %30, %32 : vector<8x32xf32>
    %34 = arith.truncf %33 : vector<8x32xf32> to vector<8x32xbf16>
    %c0_24 = arith.constant 0 : index
    %c0_25 = arith.constant 0 : index
    %35 = vector.load %arg9[%c0_24, %c0_25] : memref<8x32xbf16, #tpu.memory_space<vmem>>, vector<8x32xbf16>
    tpu.vector_store %arg9[%c0_24, %c0_25], %34 {strides = array<i32>} : memref<8x32xbf16, #tpu.memory_space<vmem>>, vector<8x32xbf16>,
    return
  }
  func.func @transform_0(%arg0: i32) -> (i32, i32) {
    %c0_i32 = arith.constant 0 : i32
    %c0_i32_0 = arith.constant 0 : i32
    return %arg0, %c0_i32 : i32, i32
  }
  func.func @transform_1(%arg0: i32) -> (i32, i32) {
    %c0_i32 = arith.constant 0 : i32
    %c0_i32_0 = arith.constant 0 : i32
    return %arg0, %c0_i32 : i32, i32
  }
  func.func @transform_2(%arg0: i32) -> (i32, i32) {
    %c0_i32 = arith.constant 0 : i32
    %c0_i32_0 = arith.constant 0 : i32
    %c0_i32_1 = arith.constant 0 : i32
    return %c0_i32, %c0_i32_0 : i32, i32
  }
  func.func @transform_3(%arg0: i32) -> (i32, i32) {
    %c0_i32 = arith.constant 0 : i32
    %c0_i32_0 = arith.constant 0 : i32
    %c0_i32_1 = arith.constant 0 : i32
    return %c0_i32, %c0_i32_0 : i32, i32
  }
  func.func @transform_4(%arg0: i32) -> (i32, i32) {
    %c0_i32 = arith.constant 0 : i32
    %c0_i32_0 = arith.constant 0 : i32
    %c0_i32_1 = arith.constant 0 : i32
    return %c0_i32, %c0_i32_0 : i32, i32
  }
  func.func @transform_5(%arg0: i32) -> (i32, i32) {
    %c0_i32 = arith.constant 0 : i32
    %c0_i32_0 = arith.constant 0 : i32
    %c0_i32_1 = arith.constant 0 : i32
    return %c0_i32, %c0_i32_0 : i32, i32
  }
  func.func @transform_6(%arg0: i32) -> (i32, i32) {
    %c0_i32 = arith.constant 0 : i32
    %c0_i32_0 = arith.constant 0 : i32
    %c0_i32_1 = arith.constant 0 : i32
    return %c0_i32, %c0_i32_0 : i32, i32
  }
  func.func @transform_7(%arg0: i32) -> (i32, i32) {
    %c0_i32 = arith.constant 0 : i32
    %c0_i32_0 = arith.constant 0 : i32
    %c0_i32_1 = arith.constant 0 : i32
    return %c0_i32, %c0_i32_0 : i32, i32
  }
  func.func @transform_8(%arg0: i32) -> (i32, i32) {
    %c0_i32 = arith.constant 0 : i32
    %c0_i32_0 = arith.constant 0 : i32
    return %arg0, %c0_i32 : i32, i32
  }
}

</mosaic_0001>

<bundles_post_ra>
// kernel: tpu_custom_call.1
= control target key start
LH: loop header
LB: loop body
LE: loop exit
PB: predicated region body
PF: predicated region fallthrough
CT: control target
= control target key end

     0   :  { %13 = vsyncpa [#allocation3], 0  ;;  %s862_s0 = inlined_call_operand.hbm [shape: f32[8,16], index: 0, kind: input, shape index: {}]   ;;  %s863_s1 = inlined_call_operand.hbm [shape: f32[8,24], index: 1, kind: input, shape index: {}]   ;;  %s864_s2 = inlined_call_operand.hbm [shape: bf16[16,64], index: 2, kind: input, shape index: {}]   ;;  %s865_s3 = inlined_call_operand.hbm [shape: bf16[24,64], index: 3, kind: input, shape index: {}]   ;;  %s866_s4 = inlined_call_operand.vmem [shape: bf16[64,64], index: 4, kind: input, shape index: {}]   ;;  %s867_s5 = inlined_call_operand.vmem [shape: bf16[64,32], index: 5, kind: input, shape index: {}]   ;;  %s868_s6 = inlined_call_operand.vmem [shape: bf16[32,32], index: 6, kind: input, shape index: {}]   ;;  %s869_s7 = inlined_call_operand.vmem [shape: f32[4,64], index: 7, kind: input, shape index: {}]   ;;  %s870_s8 = inlined_call_operand.hbm [shape: bf16[8,32], index: 8, kind: output, shape index: {}]  }
   0x1   :  { %14 = vsyncpa [#allocation6], 0 }
   0x2   :  { %15 = vsyncpa [#allocation9], 0 }
   0x3   :  { %16 = vsyncpa [#allocation4], 0  ;;  %s681_s27 = smov [#allocation5]   ;;  %s682_s29 = smov [#allocation2]  }
   0x4   :  { %s33_s28 = sshll.u32 %s681_s27, 4  ;;  %s23_s30 = sshll.u32 %s682_s29, 4  ;;  %s34_s28 = int_to_ptr.vmem [resolvable:$true] %s33_s28  ;;  %s24_s30 = int_to_ptr.vmem [resolvable:$true] %s23_s30 }
   0x5   :  { %s563_s11 = scalar_lea.hbm %s863_s1, 128 }
   0x6   :  { %p564_p0 = scmp.ne.s32.totalorder %s863_s1, %s563_s11  ;;  %p567_p1 = scmp.lt.u32.totalorder %s563_s11, %s863_s1 }
   0x8   :  { %p569_p2 = pnand %p567_p1, %p564_p0 }
   0xa   :  { %572 = shalt.err (!%p569_p2)
}
   0xb   :  { %s573_s16 = scalar_lea.vmem %s34_s28, 128  ;;  %p578_p4 = scmp.lt.s32.totalorder %s34_s28, %s34_s28 }
   0xc   :  { %p574_p3 = scmp.ne.s32.totalorder %s34_s28, %s573_s16  ;;  %p579_p5 = scmp.lt.s32.totalorder %s573_s16, %s573_s16 }
   0xe   :  { %p580_p6 = por %p579_p5, %p578_p4 }
  0x10   :  { %p581_p7 = pnand %p580_p6, %p574_p3 }
  0x12   :  { %584 = shalt.err (!%p581_p7)
}
  0x13   :  { %36 = dma.hbm_to_vmem [thread:$0]  %s863_s1, 128, %s34_s28, [#allocation6]  }
  0x14   :  { %s585_s21 = scalar_lea.hbm %s862_s0, 128 }
  0x15   :  { %p586_p8 = scmp.ne.s32.totalorder %s862_s0, %s585_s21  ;;  %p589_p9 = scmp.lt.u32.totalorder %s585_s21, %s862_s0 }
  0x17   :  { %p591_p10 = pnand %p589_p9, %p586_p8 }
  0x19   :  { %594 = shalt.err (!%p591_p10)
}
  0x1a   :  { %s595_s26 = scalar_lea.vmem %s24_s30, 128  ;;  %p600_p12 = scmp.lt.s32.totalorder %s24_s30, %s24_s30 }
  0x1b   :  { %p596_p11 = scmp.ne.s32.totalorder %s24_s30, %s595_s26  ;;  %p601_p13 = scmp.lt.s32.totalorder %s595_s26, %s595_s26 }
  0x1d   :  { %p602_p0 = por %p601_p13, %p600_p12 }
  0x1f   :  { %p603_p1 = pnand %p602_p0, %p596_p11 }
  0x21   :  { %606 = shalt.err (!%p603_p1)
}
  0x22   :  { %26 = dma.hbm_to_vmem [thread:$0]  %s862_s0, 128, %s24_s30, [#allocation3]  }
  0x23   :  { %s683_s28 = smov [#allocation7]   ;;  %s607_s11 = scalar_lea.hbm %s864_s2, 128 }
  0x24   :  { %s42_s29 = sshll.u32 %s683_s28, 4  ;;  %p608_p2 = scmp.ne.s32.totalorder %s864_s2, %s607_s11  ;;  %s43_s29 = int_to_ptr.vmem [resolvable:$true] %s42_s29 }
  0x25   :  { %p611_p3 = scmp.lt.u32.totalorder %s607_s11, %s864_s2 }
  0x27   :  { %p613_p4 = pnand %p611_p3, %p608_p2 }
  0x29   :  { %616 = shalt.err (!%p613_p4)
}
  0x2a   :  { %s617_s16 = scalar_lea.vmem %s43_s29, 128  ;;  %p622_p6 = scmp.lt.s32.totalorder %s43_s29, %s43_s29 }
  0x2b   :  { %p618_p5 = scmp.ne.s32.totalorder %s43_s29, %s617_s16  ;;  %p623_p7 = scmp.lt.s32.totalorder %s617_s16, %s617_s16 }
  0x2d   :  { %p624_p8 = por %p623_p7, %p622_p6 }
  0x2f   :  { %p625_p9 = pnand %p624_p8, %p618_p5 }
  0x31   :  { %628 = shalt.err (!%p625_p9)
}
  0x32   :  { %s684_s0 = smov 64   ;;  %s685_s30 = smov 4  }
  0x33   :  { %48 = dma.hbm_to_vmem [thread:$0]  %s864_s2, 128, %s43_s29, [#allocation6], %s684_s0, %s684_s0, %s685_s30  }
  0x34   :  { %s686_s19 = smov [#allocation8]   ;;  %s629_s23 = scalar_lea.hbm %s865_s3, 192 }
  0x35   :  { %s54_s20 = sshll.u32 %s686_s19, 4  ;;  %p630_p10 = scmp.ne.s32.totalorder %s865_s3, %s629_s23  ;;  %s55_s20 = int_to_ptr.vmem [resolvable:$true] %s54_s20 }
  0x36   :  { %p633_p11 = scmp.lt.u32.totalorder %s629_s23, %s865_s3 }
  0x38   :  { %p635_p12 = pnand %p633_p11, %p630_p10 }
  0x3a   :  { %638 = shalt.err (!%p635_p12)
}
  0x3b   :  { %s639_s27 = scalar_lea.vmem %s55_s20, 192  ;;  %p644_p0 = scmp.lt.s32.totalorder %s55_s20, %s55_s20 }
  0x3c   :  { %p640_p13 = scmp.ne.s32.totalorder %s55_s20, %s639_s27  ;;  %p645_p1 = scmp.lt.s32.totalorder %s639_s27, %s639_s27 }
  0x3e   :  { %p646_p2 = por %p645_p1, %p644_p0 }
  0x40   :  { %p647_p3 = pnand %p646_p2, %p640_p13 }
  0x42   :  { %650 = shalt.err (!%p647_p3)
}
  0x43   :  { %60 = dma.hbm_to_vmem [thread:$0]  %s865_s3, 192, %s55_s20, [#allocation9], %s684_s0, %s684_s0, %s685_s30  }
  0x44   :  { %673 = dma.done.wait [#allocation3], 128  }
  0x45   :  { %674 = vsyncadd [#allocation3], 4294967168 }
  0x46   :  { %675 = dma.done.wait [#allocation6], 256  }
  0x47   :  { %676 = vsyncadd [#allocation6], 4294967040 }
  0x48   :  { %677 = dma.done.wait [#allocation9], 192  }
  0x49   :  { %678 = vsyncadd [#allocation9], 4294967104  ;;  %v687_v0 = vmov 0.0   ;;  %vm688_vm0 = vmmov 0   ;;  %v550_v1 = vld [vmem:[#allocation8] sm:$0xff]   ;;  %v551_v2 = vld [vmem:[#allocation7] sm:$0xff]  }
  0x4a   :  { %495 = vmatprep.subr.bf16.mxu0 %v687_v0  ;;  %503 = vmatprep.subr.bf16.mxu1 %v687_v0  ;;  %vm104_vm1 = vcmask 1043456   ;;  %v552_v3 = vld [vmem:[#allocation8 + $0x8] ss:$0 sps:$4 sm:$0xff]   ;;  %vm154_vm2 = vcmask 130048   ;;  %v84_v6 = vld [vmem:[#allocation5] sm:$0xff]  ;;  %vm100_vm3 = vcmask 195584  }
  0x4b   :  { %505 = vmatprep.mubr.msk.bf16.mxu1 %vm688_vm0, %v687_v0  ;;  %499 = vmatprep.mubr.msk.bf16.mxu0 %vm688_vm0, %v687_v0  ;;  %v82_v4 = vld [vmem:[#allocation2] sm:$0xff]  ;;  %v106_v7 = vsel %vm104_vm1, %v552_v3, 0  ;;  %v85_v9 = vpack.c.bf16 %v84_v6, %v84_v6  ;;  %v554_v10 = vld [vmem:[%s866_s4 + $0x8] sm:$0xff]   ;;  %v555_v11 = vld [vmem:[%s866_s4 + $0x10] sm:$0xff]   ;;  %vm243_vm4 = vcmask 523264   ;;  %vm391_vm5 = vcmask 261120  }
  0x4c   :  { %496 = vmatpush3.bf16.msra.mxu0 %v550_v1  ;;  %504 = vmatpush3.bf16.msra.mxu1 %v551_v2  ;;  %v83_v5 = vpack.c.bf16 %v82_v4, %v82_v4  ;;  %v553_v8 = vld [vmem:[%s866_s4] sm:$0xff]   ;;  %v556_v12 = vld [vmem:[%s866_s4 + $0x18] sm:$0xff]   ;;  %v558_v14 = vld [vmem:[%s867_s5 + $0x8] sm:$0xff]   ;;  %vm436_vm6 = vcmask 257024  }
  0x4d   :  { %497 = vmatprep.subr.bf16.mxu0 %v687_v0  ;;  %509 = vmatprep.subr.bf16.mxu1 %v687_v0  ;;  %v557_v13 = vld [vmem:[%s867_s5] sm:$0xff]   ;;  %v559_v15 = vld [vmem:[%s867_s5 + $0x10] sm:$0xff]   ;;  %v560_v29 = vld [vmem:[%s867_s5 + $0x18] sm:$0xff]  }
  0x4e   :  { %v460_v20 = vld [vmem:[%s869_s7] ss:$0 sm:$0xff]  ;;  %v461_v31 = vld [vmem:[%s869_s7 + $0x1] ss:$0 sm:$0xff]  ;;  %v562_v38 = vld [vmem:[%s868_s6 + $0x8] sm:$0xff]  }
  0x4f   :  { %506 = vmatmul.mubr.msk.bf16.vlgmr.msra.gmra.mrb[0].mxu1 %vm154_vm2, %v83_v5  ;;  %v561_v30 = vld [vmem:[%s868_s6] sm:$0xff]   ;;  %s689_s6 = smov [#allocation10]  }
  0x50   :  { %498 = vmatpush3.bf16.msra.mxu0 %v106_v7  ;;  %510 = vmatpush3.bf16.msra.mxu1 %v553_v8  ;;  %v467_v39 = vld [vmem:[%s869_s7 + $0x2] ss:$0 sm:$0xff]  ;;  %v473_v47 = vld [vmem:[%s869_s7 + $0x3] ss:$0 sm:$0xff]  ;;  %s444_s3 = sshll.u32 %s689_s6, 4  ;;  %s445_s3 = int_to_ptr.vmem [resolvable:$true] %s444_s3 }
  0x51   :  { %517 = vmatprep.mubr.msk.bf16.mxu1 %vm688_vm0, %v687_v0  ;;  %511 = vmatprep.subr.bf16.mxu1 %v687_v0  ;;  %s651_s29 = scalar_lea.vmem %s445_s3, 64  ;;  %p656_p5 = scmp.lt.s32.totalorder %s445_s3, %s445_s3 }
  0x52   :  { %521 = vmatprep.subr.bf16.mxu0 %v687_v0  ;;  %p652_p4 = scmp.ne.s32.totalorder %s445_s3, %s651_s29  ;;  %p657_p6 = scmp.lt.s32.totalorder %s651_s29, %s651_s29 }
  0x53   :  { %500 = vmatmul.mubr.msk.bf16.vlgmr.msra.gmra.mrb[0].mxu0 %vm100_vm3, %v85_v9 }
  0x54   :  { %529 = vmatprep.mubr.msk.bf16.mxu0 %vm688_vm0, %v687_v0  ;;  %512 = vmatpush3.bf16.msra.mxu1 %v554_v10  ;;  %p658_p7 = por %p657_p6, %p656_p5 }
  0x55   :  { %513 = vmatprep.subr.bf16.mxu1 %v687_v0  ;;  %522 = vmatpush3.bf16.msra.mxu0 %v557_v13 }
  0x56   :  { %523 = vmatprep.subr.bf16.mxu0 %v687_v0  ;;  %p659_p8 = pnand %p658_p7, %p652_p4 }
  0x58   :  { %514 = vmatpush3.bf16.msra.mxu1 %v555_v11 }
  0x59   :  { %515 = vmatprep.subr.bf16.mxu1 %v687_v0  ;;  %524 = vmatpush3.bf16.msra.mxu0 %v558_v14 }
  0x5a   :  { %525 = vmatprep.subr.bf16.mxu0 %v687_v0 }
  0x5c   :  { %516 = vmatpush3.bf16.msra.mxu1 %v556_v12 }
  0x5d   :  { %533 = vmatprep.subr.bf16.mxu1 %v687_v0  ;;  %526 = vmatpush3.bf16.msra.mxu0 %v559_v15 }
  0x5e   :  { %527 = vmatprep.subr.bf16.mxu0 %v687_v0 }
  0x61   :  { %528 = vmatpush3.bf16.msra.mxu0 %v560_v29 }
 0x122   :  { %v192_v16 = vpop.f32.mrb[0].mxu1 }
 0x123   :  { %v507_v17 = vpop.f32.mrb[1].mxu1 }
 0x124   :  { %v195_v18 = vpop.f32.mrb[2].mxu1 }
 0x125   :  { %v508_v21 = vpop.f32.mrb[3].mxu1 }
 0x126   :  { %v142_v19 = vpop.f32.mrb[0].mxu0 }
 0x127   :  { %v193_v22 = vadd.f32 %v192_v16, %v142_v19  ;;  %v501_v23 = vpop.f32.mrb[1].mxu0 }
 0x128   :  { %v145_v24 = vpop.f32.mrb[2].mxu0 }
 0x129   :  { %v203_v25 = vadd.f32 %v460_v20, %v193_v22  ;;  %v502_v26 = vpop.f32.mrb[3].mxu0 }
 0x12b   :  { %v204_v27 = vmax.f32 %v203_v25, 0.0 }
 0x12d   :  { %v205_v28 = vpack.c.bf16 %v204_v27, %v204_v27 }
 0x12f   :  { %518 = vmatmul.mubr.msk.bf16.vlgmr.msra.gmra.mrb[4].mxu1 %vm243_vm4, %v205_v28 }
 0x130   :  { %537 = vmatprep.mubr.msk.bf16.mxu1 %vm688_vm0, %v687_v0  ;;  %534 = vmatpush3.bf16.msra.mxu1 %v561_v30 }
 0x131   :  { %535 = vmatprep.subr.bf16.mxu1 %v687_v0 }
 0x134   :  { %536 = vmatpush3.bf16.msra.mxu1 %v562_v38 }
 0x202   :  { %v281_v32 = vpop.f32.mrb[4].mxu1 }
 0x203   :  { %v282_v33 = vadd.f32 %v461_v31, %v281_v32  ;;  %v519_v34 = vpop.f32.mrb[5].mxu1 }
 0x204   :  { %v284_v35 = vpop.f32.mrb[6].mxu1 }
 0x205   :  { %v287_v36 = vpack.c.bf16 %v282_v33, %v282_v33  ;;  %v520_v37 = vpop.f32.mrb[7].mxu1 }
 0x207   :  { %530 = vmatmul.mubr.msk.bf16.vlgmr.msra.gmra.mrb[4].mxu0 %vm243_vm4, %v287_v36 }
 0x2da   :  { %v362_v40 = vpop.f32.mrb[4].mxu0 }
 0x2db   :  { %v363_v41 = vadd.f32 %v467_v39, %v362_v40  ;;  %v531_v42 = vpop.f32.mrb[5].mxu0 }
 0x2dc   :  { %v365_v43 = vpop.f32.mrb[6].mxu0 }
 0x2dd   :  { %v368_v44 = vmax.f32 %v363_v41, 0.0  ;;  %v532_v45 = vpop.f32.mrb[7].mxu0 }
 0x2df   :  { %v369_v46 = vpack.c.bf16 %v368_v44, %v368_v44 }
 0x2e1   :  { %538 = vmatmul.mubr.msk.bf16.vlgmr.msra.gmra.mrb[8].mxu1 %vm391_vm5, %v369_v46 }
 0x3b4   :  { %v429_v48 = vpop.f32.mrb[8].mxu1 }
 0x3b5   :  { %v430_v49 = vadd.f32 %v473_v47, %v429_v48  ;;  %v539_v50 = vpop.f32.mrb[9].mxu1 }
 0x3b6   :  { %v432_v51 = vpop.f32.mrb[10].mxu1 }
 0x3b7   :  { %v435_v52 = vpack.c.bf16 %v430_v49, %v430_v49  ;;  %v540_v53 = vpop.f32.mrb[11].mxu1 }
 0x3b9   :  { %437 = vst.msk [vmem:[#allocation10] sm:$0xf] %vm436_vm6, %v435_v52 }
 0x3ba   :  { %662 = shalt.err (!%p659_p8)
}
 0x3bb   :  { %s663_s10 = scalar_lea.hbm %s870_s8, 64 }
 0x3bc   :  { %p664_p9 = scmp.ne.s32.totalorder %s870_s8, %s663_s10  ;;  %p667_p10 = scmp.lt.u32.totalorder %s663_s10, %s870_s8 }
 0x3be   :  { %p669_p11 = pnand %p667_p10, %p664_p9 }
 0x3c0   :  { %672 = shalt.err (!%p669_p11)
}
 0x3c1   :  { %447 = dma.vmem_to_hbm [thread:$0]  %s445_s3, 64, %s870_s8, [#allocation4]  }
 0x3c2   :  { %679 = dma.done.wait [#allocation4], 64  }
 0x3c3   :  { %680 = vsyncadd [#allocation4], 4294967232 }
 0x3c4   :  { %451 = vsyncpa [#allocation3], 1 }
 0x3c5   :  { %452 = vsyncpa [#allocation6], 1 }
 0x3c6   :  { %453 = vsyncpa [#allocation9], 1 }
 0x3c7   :  { %454 = vsyncpa [#allocation4], 1 }

</bundles_post_ra>
